<compile_context>
chip_gen: v7x
topology: tpu7x:2x2x1
jax: 0.10.0
libtpu: 0.0.40
codegen_flags: <defaults>
</compile_context>

<pallas_src>
import jax
import jax.numpy as jnp
from jax.experimental import pallas as pl
from jax.experimental.pallas import tpu as pltpu


def _round_up(n, m):
    return ((n + m - 1) // m) * m


def _cdiv(a, b):
    return (a + b - 1) // b


def _vmem_capacity_bytes():
    try:
        return int(pltpu.get_tpu_info().vmem_capacity_bytes)
    except Exception:
        return 64 << 20  # conservative fallback: v7x per-TensorCore VMEM


def _choose_batch_tiling(B, H, block_batch, weight_bytes, vmem_cap):
    """Pick (tile_batch, padded_batch, num_tiles) under a VMEM budget."""
    usable = int(0.7 * vmem_cap)  # headroom for compiler temps / spills
    # Bytes per batch lane: kernel intermediates (h1 f32 + h1 bf16 + h2 f32 +
    # layer-3 temps) ~ 14*H, plus double-buffered x/out tiles ~ 24.
    per_lane = 14 * H + 24
    tb_max = (usable - 2 * weight_bytes) // per_lane
    tb_max = max(128, (tb_max // 128) * 128)
    tb_max = min(tb_max, max(128, (block_batch // 128) * 128))

    b_ceil = _round_up(B, 128)
    # Keep >=2 balanced tiles when possible so the "parallel" batch axis can be
    # sharded across both v7x TensorCores (near-free on single-TC v5e/v6e).
    min_tiles = 2 if b_ceil >= 256 else 1
    n_tiles = max(_cdiv(b_ceil, tb_max), min_tiles)
    tb = _round_up(_cdiv(B, n_tiles), 128)
    b_pad = n_tiles * tb
    return tb, b_pad, n_tiles


def _ffn_kernel(xT_ref, w1t_ref, b1_ref, w2t_ref, b2_ref, w3_ref, b3_ref, o_ref):
    # xT_ref: (2, TB) -- batch on lanes.
    x0 = xT_ref[0:1, :]                                   # (1, TB)
    x1 = xT_ref[1:2, :]                                   # (1, TB)
    w1t = w1t_ref[...]                                    # (H, 2)

    # Layer 1 (in_features=2): two VPU broadcast FMAs instead of a K=2 matmul.
    h1 = w1t[:, 0:1] * x0 + w1t[:, 1:2] * x1 + b1_ref[...]      # (H, TB) f32
    h1 = jnp.maximum(h1, 0.0)

    # Layer 2 (HxH): the only real matmul -> MXU.  Weight dtype (bf16 or f32)
    # was chosen once in the wrapper; only the activation is cast per step.
    h2 = jnp.dot(w2t_ref[...], h1.astype(w2t_ref.dtype),
                 preferred_element_type=jnp.float32) + b2_ref[...]  # (H, TB)
    h2 = jnp.maximum(h2, 0.0)

    # Layer 3 (out_features=1): VPU multiply + XLU sublane reduce -> (1, TB).
    out = jnp.sum(h2 * w3_ref[...], axis=0, keepdims=True) + b3_ref[...]
    o_ref[...] = out.astype(o_ref.dtype)


def simple_feedforward(x, params, *, block_batch=32768, use_bf16_matmul=True,
                       feature_major=False):
    """x: (B, 2) float32, or (2, B) if feature_major=True.
    params: nn.Linear-style dict (weights stored as (in_features, out_features),
    biases as (1, out_features)).  Returns (B, 1) float32."""
    w1, b1, w2, b2, w3, b3 = (params[k] for k in ("w1", "b1", "w2", "b2", "w3", "b3"))
    B = x.shape[1] if feature_major else x.shape[0]
    H = w1.shape[1]

    # One-time weight layout / dtype plumbing (done once per call, outside the
    # grid loop -- weights use constant index_maps so they stay VMEM-resident).
    w2_dtype = jnp.bfloat16 if use_bf16_matmul else jnp.float32
    w1t = w1.T                                            # (H, 2)
    b1c = b1.reshape(H, 1)                                # (H, 1)
    w2t = w2.T.astype(w2_dtype)                           # (H, H)  y^T = W^T @ x^T
    b2c = b2.reshape(H, 1)                                # (H, 1)
    w3c = w3.reshape(H, 1)                                # (H, 1)
    b3s = b3.reshape(1, 1)                                # (1, 1)
    weight_arrays = (w1t, b1c, w2t, b2c, w3c, b3s)
    weight_bytes = sum(int(a.size) * a.dtype.itemsize for a in weight_arrays)

    # Batch tiling sized from the actual chip VMEM (64 MiB/TC on v7x vs
    # 128 MiB on v5e/v6e), balanced across >=2 tiles for megacore.
    vmem_cap = _vmem_capacity_bytes()
    tb, b_pad, n_tiles = _choose_batch_tiling(B, H, block_batch, weight_bytes, vmem_cap)
    vmem_limit = int(0.9 * vmem_cap)

    # Layout plumbing: batch -> lanes.  Skip pad when not needed; skip the
    # transpose entirely when the caller already supplies (2, B).
    xT = x if feature_major else x.T                      # (2, B)
    if b_pad != B:
        xT = jnp.pad(xT, ((0, 0), (0, b_pad - B)))

    const = lambda a: pl.BlockSpec(a.shape, lambda i: (0, 0))   # VMEM-resident
    # NOTE: constant-index weight blocks are never re-fetched; their second
    # pipeline buffer is accounted for in the TB budget above.
    cost = pl.CostEstimate(
        flops=2 * B * (2 * H + H * H + H),
        transcendentals=0,
        bytes_accessed=B * 3 * 4 + weight_bytes,
    )

    outT = pl.pallas_call(
        _ffn_kernel,
        out_shape=jax.ShapeDtypeStruct((1, b_pad), jnp.float32),
        grid=(n_tiles,),
        in_specs=[
            pl.BlockSpec((2, tb), lambda i: (0, i)),      # x^T streamed per tile
            const(w1t), const(b1c), const(w2t), const(b2c), const(w3c), const(b3s),
        ],
        out_specs=pl.BlockSpec((1, tb), lambda i: (0, i)),  # lane-dense output
        compiler_params=pltpu.CompilerParams(
            dimension_semantics=("parallel",),
            vmem_limit_bytes=vmem_limit,
        ),
        cost_estimate=cost,
    )(xT, w1t, b1c, w2t, b2c, w3c, b3s)

    return outT[0, :B].reshape(B, 1)


def init_params(key, hidden_size):
    """Deterministic init matching nn.Linear shapes (weights stored transposed)."""
    k1, k2, k3, k4, k5, k6 = jax.random.split(key, 6)

    def lin(kw, kb, fan_in, fan_out):
        bound = 1.0 / jnp.sqrt(fan_in)
        w = jax.random.uniform(kw, (fan_in, fan_out), jnp.float32, -bound, bound)
        b = jax.random.uniform(kb, (1, fan_out), jnp.float32, -bound, bound)
        return w, b

    w1, b1 = lin(k1, k2, 2, hidden_size)
    w2, b2 = lin(k3, k4, hidden_size, hidden_size)
    w3, b3 = lin(k5, k6, hidden_size, 1)
    return dict(w1=w1, b1=b1, w2=w2, b2=b2, w3=w3, b3=b3)


if __name__ == "__main__":
    key = jax.random.PRNGKey(0)
    kx, kx2, kp = jax.random.split(key, 3)

    hidden_size = 32
    params = init_params(kp, hidden_size)

    # Pure-JAX references.
    def ref_f32(x, p):
        h1 = jnp.maximum(x @ p["w1"] + p["b1"], 0.0)
        h2 = jnp.maximum(h1 @ p["w2"] + p["b2"], 0.0)
        return h2 @ p["w3"] + p["b3"]

    def ref_bf16(x, p):  # mirrors the kernel's bf16-in / f32-accum HxH matmul
        h1 = jnp.maximum(x @ p["w1"] + p["b1"], 0.0)
        h2 = jnp.dot(h1.astype(jnp.bfloat16), p["w2"].astype(jnp.bfloat16),
                     preferred_element_type=jnp.float32) + p["b2"]
        h2 = jnp.maximum(h2, 0.0)
        return h2 @ p["w3"] + p["b3"]

    # Small batch (single tile).
    x_small = jax.random.normal(kx, (8, 2), jnp.float32)
    out_small = jax.block_until_ready(simple_feedforward(x_small, params))
    assert out_small.shape == (8, 1), out_small.shape
    assert jnp.allclose(out_small, ref_bf16(x_small, params), atol=5e-3, rtol=5e-3)
    assert jnp.allclose(out_small, ref_f32(x_small, params), atol=5e-2, rtol=5e-2)

    # Batch that is not a multiple of 128: exercises the balanced multi-tile
    # grid, padding slice-off, and the >=2-tile megacore path on v7x.
    x_med = jax.random.normal(kx2, (300, 2), jnp.float32)
    out_med = jax.block_until_ready(simple_feedforward(x_med, params))
    assert out_med.shape == (300, 1), out_med.shape
    assert jnp.allclose(out_med, ref_bf16(x_med, params), atol=5e-3, rtol=5e-3)
    assert jnp.allclose(out_med, ref_f32(x_med, params), atol=5e-2, rtol=5e-2)

    # Pure-f32 matmul path (closer parity with the f32 PyTorch reference).
    out_f32 = jax.block_until_ready(
        simple_feedforward(x_small, params, use_bf16_matmul=False))
    assert jnp.allclose(out_f32, ref_f32(x_small, params), atol=2e-2, rtol=2e-2)

    print("KERNEL_OK")
</pallas_src>

<mosaic_0001>
module attributes {stable_mosaic.version = 11 : i64} {
  func.func @_ffn_kernel(%arg0: i32, %arg1: memref<2x128xf32, #tpu.memory_space<vmem>>, %arg2: memref<32x2xf32, #tpu.memory_space<vmem>>, %arg3: memref<32x1xf32, #tpu.memory_space<vmem>>, %arg4: memref<32x32xbf16, #tpu.memory_space<vmem>>, %arg5: memref<32x1xf32, #tpu.memory_space<vmem>>, %arg6: memref<32x1xf32, #tpu.memory_space<vmem>>, %arg7: memref<1x1xf32, #tpu.memory_space<vmem>>, %arg8: memref<1x128xf32, #tpu.memory_space<vmem>>) attributes {dimension_semantics = [#tpu.dimension_semantics<parallel>], iteration_bounds = array<i64: 1>, scalar_prefetch = 0 : i64, scratch_operands = 0 : i64, tpu.core_type = #tpu.core_type<tc>, window_params = [{transform_indices = @transform_0, window_bounds = array<i64: 2, 128>}, {pipeline_mode = #tpu.pipeline_mode<synchronous>, transform_indices = @transform_1, window_bounds = array<i64: 32, 2>}, {pipeline_mode = #tpu.pipeline_mode<synchronous>, transform_indices = @transform_2, window_bounds = array<i64: 32, 1>}, {pipeline_mode = #tpu.pipeline_mode<synchronous>, transform_indices = @transform_3, window_bounds = array<i64: 32, 32>}, {pipeline_mode = #tpu.pipeline_mode<synchronous>, transform_indices = @transform_4, window_bounds = array<i64: 32, 1>}, {pipeline_mode = #tpu.pipeline_mode<synchronous>, transform_indices = @transform_5, window_bounds = array<i64: 32, 1>}, {pipeline_mode = #tpu.pipeline_mode<synchronous>, transform_indices = @transform_6, window_bounds = array<i64: 1, 1>}, {transform_indices = @transform_7, window_bounds = array<i64: 1, 128>}]} {
    %c0 = arith.constant 0 : index
    %c0_0 = arith.constant 0 : index
    %0 = vector.load %arg1[%c0, %c0_0] : memref<2x128xf32, #tpu.memory_space<vmem>>, vector<1x128xf32>
    %c1 = arith.constant 1 : index
    %c0_1 = arith.constant 0 : index
    %1 = vector.load %arg1[%c1, %c0_1] : memref<2x128xf32, #tpu.memory_space<vmem>>, vector<1x128xf32>
    %c0_2 = arith.constant 0 : index
    %c0_3 = arith.constant 0 : index
    %2 = vector.load %arg2[%c0_2, %c0_3] : memref<32x2xf32, #tpu.memory_space<vmem>>, vector<32x2xf32>
    %3 = vector.extract_strided_slice %2 {offsets = [0, 0], sizes = [32, 1], strides = [1, 1]} : vector<32x2xf32> to vector<32x1xf32>
    %4 = vector.broadcast %3 : vector<32x1xf32> to vector<32x128xf32>
    %5 = vector.broadcast %0 : vector<1x128xf32> to vector<32x128xf32>
    %6 = arith.mulf %4, %5 : vector<32x128xf32>
    %7 = vector.extract_strided_slice %2 {offsets = [0, 1], sizes = [32, 1], strides = [1, 1]} : vector<32x2xf32> to vector<32x1xf32>
    %8 = vector.broadcast %7 : vector<32x1xf32> to vector<32x128xf32>
    %9 = vector.broadcast %1 : vector<1x128xf32> to vector<32x128xf32>
    %10 = arith.mulf %8, %9 : vector<32x128xf32>
    %11 = arith.addf %6, %10 : vector<32x128xf32>
    %c0_4 = arith.constant 0 : index
    %c0_5 = arith.constant 0 : index
    %12 = vector.load %arg3[%c0_4, %c0_5] : memref<32x1xf32, #tpu.memory_space<vmem>>, vector<32x1xf32>
    %13 = vector.broadcast %12 : vector<32x1xf32> to vector<32x128xf32>
    %14 = arith.addf %11, %13 : vector<32x128xf32>
    %cst = arith.constant 0.000000e+00 : f32
    %15 = vector.broadcast %cst : f32 to vector<32x128xf32>
    %16 = arith.maximumf %14, %15 : vector<32x128xf32>
    %c0_6 = arith.constant 0 : index
    %c0_7 = arith.constant 0 : index
    %17 = vector.load %arg4[%c0_6, %c0_7] : memref<32x32xbf16, #tpu.memory_space<vmem>>, vector<32x32xbf16>
    %18 = arith.truncf %16 : vector<32x128xf32> to vector<32x128xbf16>
    %cst_8 = arith.constant dense<0.000000e+00> : vector<32x128xf32>
    %19 = tpu.matmul %17, %18, %cst_8 {dimension_numbers = #tpu.dot_dimension_numbers<[1], [0], [0], [1], [0, 0, 1, 1], [], []>} : vector<32x32xbf16>, vector<32x128xbf16>, vector<32x128xf32> -> vector<32x128xf32>
    %c0_9 = arith.constant 0 : index
    %c0_10 = arith.constant 0 : index
    %20 = vector.load %arg5[%c0_9, %c0_10] : memref<32x1xf32, #tpu.memory_space<vmem>>, vector<32x1xf32>
    %21 = vector.broadcast %20 : vector<32x1xf32> to vector<32x128xf32>
    %22 = arith.addf %19, %21 : vector<32x128xf32>
    %cst_11 = arith.constant 0.000000e+00 : f32
    %23 = vector.broadcast %cst_11 : f32 to vector<32x128xf32>
    %24 = arith.maximumf %22, %23 : vector<32x128xf32>
    %c0_12 = arith.constant 0 : index
    %c0_13 = arith.constant 0 : index
    %25 = vector.load %arg6[%c0_12, %c0_13] : memref<32x1xf32, #tpu.memory_space<vmem>>, vector<32x1xf32>
    %26 = vector.broadcast %25 : vector<32x1xf32> to vector<32x128xf32>
    %27 = arith.mulf %24, %26 : vector<32x128xf32>
    %cst_14 = arith.constant dense<0.000000e+00> : vector<128xf32>
    %28 = vector.multi_reduction <add>, %27, %cst_14 [0] : vector<32x128xf32> to vector<128xf32>
    %29 = vector.shape_cast %28 : vector<128xf32> to vector<1x128xf32>
    %c0_15 = arith.constant 0 : index
    %c0_16 = arith.constant 0 : index
    %30 = vector.load %arg7[%c0_15, %c0_16] : memref<1x1xf32, #tpu.memory_space<vmem>>, vector<1x1xf32>
    %31 = vector.broadcast %30 : vector<1x1xf32> to vector<1x128xf32>
    %32 = arith.addf %29, %31 : vector<1x128xf32>
    %c0_17 = arith.constant 0 : index
    %c0_18 = arith.constant 0 : index
    %33 = vector.load %arg8[%c0_17, %c0_18] : memref<1x128xf32, #tpu.memory_space<vmem>>, vector<1x128xf32>
    tpu.vector_store %arg8[%c0_17, %c0_18], %32 {strides = array<i32>} : memref<1x128xf32, #tpu.memory_space<vmem>>, vector<1x128xf32>,
    return
  }
  func.func @transform_0(%arg0: i32) -> (i32, i32) {
    %c0_i32 = arith.constant 0 : i32
    %c0_i32_0 = arith.constant 0 : i32
    return %c0_i32, %arg0 : i32, i32
  }
  func.func @transform_1(%arg0: i32) -> (i32, i32) {
    %c0_i32 = arith.constant 0 : i32
    %c0_i32_0 = arith.constant 0 : i32
    %c0_i32_1 = arith.constant 0 : i32
    return %c0_i32, %c0_i32_0 : i32, i32
  }
  func.func @transform_2(%arg0: i32) -> (i32, i32) {
    %c0_i32 = arith.constant 0 : i32
    %c0_i32_0 = arith.constant 0 : i32
    %c0_i32_1 = arith.constant 0 : i32
    return %c0_i32, %c0_i32_0 : i32, i32
  }
  func.func @transform_3(%arg0: i32) -> (i32, i32) {
    %c0_i32 = arith.constant 0 : i32
    %c0_i32_0 = arith.constant 0 : i32
    %c0_i32_1 = arith.constant 0 : i32
    return %c0_i32, %c0_i32_0 : i32, i32
  }
  func.func @transform_4(%arg0: i32) -> (i32, i32) {
    %c0_i32 = arith.constant 0 : i32
    %c0_i32_0 = arith.constant 0 : i32
    %c0_i32_1 = arith.constant 0 : i32
    return %c0_i32, %c0_i32_0 : i32, i32
  }
  func.func @transform_5(%arg0: i32) -> (i32, i32) {
    %c0_i32 = arith.constant 0 : i32
    %c0_i32_0 = arith.constant 0 : i32
    %c0_i32_1 = arith.constant 0 : i32
    return %c0_i32, %c0_i32_0 : i32, i32
  }
  func.func @transform_6(%arg0: i32) -> (i32, i32) {
    %c0_i32 = arith.constant 0 : i32
    %c0_i32_0 = arith.constant 0 : i32
    %c0_i32_1 = arith.constant 0 : i32
    return %c0_i32, %c0_i32_0 : i32, i32
  }
  func.func @transform_7(%arg0: i32) -> (i32, i32) {
    %c0_i32 = arith.constant 0 : i32
    %c0_i32_0 = arith.constant 0 : i32
    return %c0_i32, %arg0 : i32, i32
  }
}

</mosaic_0001>

<bundles_post_ra>
// kernel: tpu_custom_call.1
= control target key start
LH: loop header
LB: loop body
LE: loop exit
PB: predicated region body
PF: predicated region fallthrough
CT: control target
= control target key end

     0   :  { %s460_s0 = inlined_call_operand.vmem [shape: f32[2,128], index: 0, kind: input, shape index: {}]   ;;  %s461_s1 = inlined_call_operand.vmem [shape: f32[32,2], index: 1, kind: input, shape index: {}]   ;;  %s462_s2 = inlined_call_operand.vmem [shape: f32[32,1], index: 2, kind: input, shape index: {}]   ;;  %s463_s3 = inlined_call_operand.vmem [shape: bf16[32,32], index: 3, kind: input, shape index: {}]   ;;  %s464_s4 = inlined_call_operand.vmem [shape: f32[32,1], index: 4, kind: input, shape index: {}]   ;;  %s465_s5 = inlined_call_operand.vmem [shape: f32[32,1], index: 5, kind: input, shape index: {}]   ;;  %s466_s6 = inlined_call_operand.<no memory space> [shape: f32[1,1], index: 6, kind: input, shape index: {}]   ;;  %s467_s7 = inlined_call_operand.hbm [shape: f32[1,128], index: 7, kind: output, shape index: {}]  }
   0x1   :  { %v12_v0 = vstv %s466_s6 }
   0x2   :  { %13 = vst [vmem:[#allocation2] sm:$0x1] %v12_v0 }
   0x3   :  { %v34_v1 = vld [vmem:[%s461_s1 + $0x10] sm:$0xff]  ;;  %v32_v2 = vld [vmem:[%s461_s1] sm:$0xff]  ;;  %v340_v3 = vmov 1   ;;  %v33_v4 = vld [vmem:[%s461_s1 + $0x8] sm:$0xff]  ;;  %v341_v5 = vmov 0  }
   0x4   :  { %310 = vset.pattern.permute.xlu0 %v340_v3  ;;  %308 = vset.pattern.permute.xlu1 %v340_v3 }
   0x5   :  { %73 = vperm.xlu0 %310, %v34_v1   ;;  %65 = vperm.xlu1 %308, %v32_v2  }
   0x9   :  { %311 = vset.pattern.permute.xlu0 %v341_v5  ;;  %69 = vperm.xlu1 %308, %v33_v4  }
   0xa   :  { %38 = vperm.xlu0 %311, %v32_v2  }
   0xb   :  { %14 = vsyncpa [#allocation4], 0  ;;  %v35_v6 = vld [vmem:[%s461_s1 + $0x18] sm:$0xff]  ;;  %v93_v7 = vld [vmem:[%s462_s2 + $0x8] sm:$0xff]  ;;  %vm164_vm0 = vcmask 261120  }
   0xc   :  { %v92_v8 = vld [vmem:[%s462_s2] sm:$0xff]  ;;  %v94_v10 = vld [vmem:[%s462_s2 + $0x10] sm:$0xff]  ;;  %v95_v12 = vld [vmem:[%s462_s2 + $0x18] sm:$0xff] }
   0xd   :  { %309 = vset.pattern.permute.xlu1 %v341_v5  ;;  %v130_v9 = vld [vmem:[%s464_s4] sm:$0xff]  ;;  %v132_v11 = vld [vmem:[%s464_s4 + $0x10] sm:$0xff]  ;;  %v131_v14 = vld [vmem:[%s464_s4 + $0x8] sm:$0xff] }
   0xe   :  { %43 = vperm.xlu0 %311, %v33_v4   ;;  %53 = vperm.xlu1 %309, %v35_v6   ;;  %v224_v13 = vld [vmem:[%s465_s5] sm:$0xff]  ;;  %v226_v15 = vld [vmem:[%s465_s5 + $0x10] sm:$0xff]  ;;  %v133_v16 = vld [vmem:[%s464_s4 + $0x18] sm:$0xff] }
   0xf   :  { %v261_v17 = vld [vmem:[#allocation2] sm:$0x1]  ;;  %v225_v19 = vld [vmem:[%s465_s5 + $0x8] sm:$0xff]  ;;  %v227_v20 = vld [vmem:[%s465_s5 + $0x18] sm:$0xff] }
  0x10   :  { %v314_v18 = vld [vmem:[%s463_s3] sm:$0xff]   ;;  %v315_v57 = vld [vmem:[%s463_s3 + $0x8] sm:$0xff]   ;;  %s342_s3 = smov [#allocation3]  }
  0x11   :  { %301 = vmatprep.mubr.msk.bf16.mxu0 %vm164_vm0, %v314_v18  ;;  %v287_v27 = vld [vmem:[%s460_s0] ss:$0 sm:$0xff]  ;;  %v288_v29 = vld [vmem:[%s460_s0 + $0x1] ss:$0 sm:$0xff]  ;;  %s279_s13 = sshll.u32 %s342_s3, 4  ;;  %s280_s13 = int_to_ptr.vmem [resolvable:$true] %s279_s13 }
  0x12   :  { %48 = vperm.xlu0 %311, %v34_v1   ;;  %312 = vset.pattern.permute.xlu1 %v340_v3  ;;  %s316_s14 = scalar_lea.vmem %s280_s13, 16  ;;  %s320_s15 = scalar_lea.vmem %s280_s13, 32 }
  0x13   :  { %77 = vperm.xlu1 %312, %v35_v6   ;;  %p317_p0 = scmp.ne.s32.totalorder %s280_s13, %s316_s14  ;;  %p321_p1 = scmp.lt.s32.totalorder %s280_s13, %s280_s13 }
  0x14   :  { %p322_p2 = scmp.lt.s32.totalorder %s320_s15, %s316_s14 }
  0x16   :  { %103 = vperm.xlu0 %311, %v93_v7   ;;  %p323_p3 = por %p322_p2, %p321_p1 }
  0x17   :  { %313 = vset.pattern.permute.xlu1 %v341_v5 }
  0x18   :  { %98 = vperm.xlu1 %313, %v92_v8   ;;  %p324_p4 = pnand %p323_p3, %p317_p0 }
  0x1a   :  { %136 = vperm.xlu0 %311, %v130_v9  }
  0x1c   :  { %108 = vperm.xlu1 %313, %v94_v10  }
  0x1e   :  { %146 = vperm.xlu0 %311, %v132_v11  }
  0x20   :  { %113 = vperm.xlu1 %313, %v95_v12  }
  0x22   :  { %230 = vperm.xlu0 %311, %v224_v13  }
  0x24   :  { %141 = vperm.xlu1 %313, %v131_v14  }
  0x26   :  { %240 = vperm.xlu0 %311, %v226_v15  }
  0x28   :  { %151 = vperm.xlu1 %313, %v133_v16  }
  0x2a   :  { %264 = vperm.xlu0 %311, %v261_v17  }
  0x2c   :  { %235 = vperm.xlu1 %313, %v225_v19  }
  0x30   :  { %245 = vperm.xlu1 %313, %v227_v20   ;;  %v267_v20 = vlaneseq }
  0x84   :  { %v66_v21 = vpop.permute.xlu1 %65  ;;  %v74_v22 = vpop.permute.xlu0 %73 }
  0x85   :  { %v84_v34 = vmul.f32 %v288_v29, %v66_v21  ;;  %v86_v42 = vmul.f32 %v288_v29, %v74_v22 }
  0x88   :  { %v70_v23 = vpop.permute.xlu1 %69 }
  0x89   :  { %v39_v24 = vpop.permute.xlu0 %38  ;;  %v85_v31 = vmul.f32 %v288_v29, %v70_v23  ;;  %v268_v23 = vshrl.u32 %v267_v20, 7 }
  0x8a   :  { %v60_v32 = vmul.f32 %v287_v27, %v39_v24 }
  0x8c   :  { %v88_v38 = vadd.f32 %v84_v34, %v60_v32 }
  0x8d   :  { %v44_v25 = vpop.permute.xlu0 %43  ;;  %v54_v26 = vpop.permute.xlu1 %53 }
  0x8e   :  { %v61_v28 = vmul.f32 %v287_v27, %v44_v25  ;;  %v63_v47 = vmul.f32 %v287_v27, %v54_v26  ;;  %v269_v26 = vsub.s32 0, %v268_v23 }
  0x90   :  { %v89_v35 = vadd.f32 %v85_v31, %v61_v28 }
  0x91   :  { %v49_v30 = vpop.permute.xlu0 %48 }
  0x92   :  { %v78_v33 = vpop.permute.xlu1 %77  ;;  %v62_v40 = vmul.f32 %v287_v27, %v49_v30 }
  0x93   :  { %v87_v43 = vmul.f32 %v288_v29, %v78_v33 }
  0x94   :  { %v90_v48 = vadd.f32 %v86_v42, %v62_v40 }
  0x95   :  { %v104_v36 = vpop.permute.xlu0 %103  ;;  %v91_v51 = vadd.f32 %v87_v43, %v63_v47 }
  0x96   :  { %v117_v37 = vadd.f32 %v104_v36, %v89_v35 }
  0x97   :  { %v99_v39 = vpop.permute.xlu1 %98 }
  0x98   :  { %v116_v41 = vadd.f32 %v99_v39, %v88_v38  ;;  %v121_v44 = vmax.f32 %v117_v37, 0.0 }
  0x99   :  { %v137_v58 = vpop.permute.xlu0 %136 }
  0x9a   :  { %v120_v45 = vmax.f32 %v116_v41, 0.0 }
  0x9b   :  { %v109_v46 = vpop.permute.xlu1 %108 }
  0x9c   :  { %v128_v49 = vpack.c.bf16 %v121_v44, %v120_v45  ;;  %v118_v50 = vadd.f32 %v109_v46, %v90_v48 }
  0x9d   :  { %v147_v60 = vpop.permute.xlu0 %146 }
  0x9e   :  { %297 = vmatprep.subr.bf16.mxu0 %v128_v49  ;;  %v122_v54 = vmax.f32 %v118_v50, 0.0 }
  0x9f   :  { %v114_v52 = vpop.permute.xlu1 %113  ;;  %298 = vmatpush3.bf16.msra.mxu0 %v128_v49 }
  0xa0   :  { %v119_v53 = vadd.f32 %v114_v52, %v91_v51 }
  0xa1   :  { %v231_v3 = vpop.permute.xlu0 %230 }
  0xa2   :  { %v123_v55 = vmax.f32 %v119_v53, 0.0 }
  0xa3   :  { %v142_v59 = vpop.permute.xlu1 %141 }
  0xa4   :  { %v129_v56 = vpack.c.bf16 %v123_v55, %v122_v54 }
  0xa5   :  { %v241_v14 = vpop.permute.xlu0 %240 }
  0xa6   :  { %299 = vmatprep.subr.bf16.mxu0 %v129_v56 }
  0xa7   :  { %300 = vmatpush3.bf16.msra.mxu0 %v129_v56  ;;  %v152_v61 = vpop.permute.xlu1 %151 }
  0xa9   :  { %v265_v28 = vpop.permute.xlu0 %264 }
  0xaa   :  { %302 = vmatmul.mubr.msk.bf16.vlgmr.msra.gmra.mrb[0].mxu0 %vm164_vm0, %v315_v57  ;;  %v270_v30 = vrot.slane %v265_v28, %v269_v26 }
  0xab   :  { %v236_v8 = vpop.permute.xlu1 %235 }
  0xaf   :  { %v246_v17 = vpop.permute.xlu1 %245 }
 0x17d   :  { %v303_v62 = vpop.f32.mrb[0].mxu0 }
 0x17e   :  { %v205_v63 = vpop.f32.mrb[1].mxu0  ;;  %v214_v0 = vadd.f32 %v303_v62, %v147_v60 }
 0x17f   :  { %v206_v1 = vadd.f32 %v205_v63, %v137_v58  ;;  %v304_v2 = vpop.f32.mrb[2].mxu0 }
 0x180   :  { %v208_v4 = vpop.f32.mrb[3].mxu0  ;;  %v217_v6 = vadd.f32 %v304_v2, %v152_v61  ;;  %v222_v9 = vmax.f32 %v214_v0, 0.0 }
 0x181   :  { %v220_v5 = vmax.f32 %v206_v1, 0.0  ;;  %v209_v7 = vadd.f32 %v208_v4, %v142_v59 }
 0x182   :  { %v223_v12 = vmax.f32 %v217_v6, 0.0  ;;  %v250_v15 = vmul.f32 %v241_v14, %v222_v9 }
 0x183   :  { %v221_v10 = vmax.f32 %v209_v7, 0.0  ;;  %v248_v11 = vmul.f32 %v231_v3, %v220_v5 }
 0x184   :  { %v251_v18 = vmul.f32 %v246_v17, %v223_v12 }
 0x185   :  { %v249_v13 = vmul.f32 %v236_v8, %v221_v10 }
 0x187   :  { %v252_v16 = vadd.f32 %v249_v13, %v248_v11 }
 0x189   :  { %v253_v19 = vadd.f32 %v252_v16, %v250_v15 }
 0x18b   :  { %v254_v21 = vadd.f32 %v253_v19, %v251_v18 }
 0x18d   :  { %v255_v22 = vrot.slane %v254_v21, 4 }
 0x18f   :  { %v256_v24 = vadd.f32 %v255_v22, %v254_v21 }
 0x191   :  { %v257_v25 = vrot.slane %v256_v24, 2 }
 0x193   :  { %v258_v27 = vadd.f32 %v257_v25, %v256_v24 }
 0x195   :  { %v259_v29 = vrot.slane %v258_v27, 1 }
 0x197   :  { %v260_v31 = vadd.f32 %v259_v29, %v258_v27 }
 0x199   :  { %v271_v32 = vadd.f32 %v270_v30, %v260_v31 }
 0x19b   :  { %272 = vst [vmem:[#allocation3] sm:$0x1] %v271_v32 }
 0x19c   :  { %327 = shalt.err (!%p324_p4)
}
 0x19d   :  { %s328_s17 = scalar_lea.hbm %s467_s7, 16 }
 0x19e   :  { %p329_p5 = scmp.ne.s32.totalorder %s467_s7, %s328_s17  ;;  %p332_p6 = scmp.lt.u32.totalorder %s328_s17, %s467_s7 }
 0x1a0   :  { %p334_p7 = pnand %p332_p6, %p329_p5 }
 0x1a2   :  { %337 = shalt.err (!%p334_p7)
}
 0x1a3   :  { %282 = dma.vmem_to_hbm [thread:$0]  %s280_s13, 16, %s467_s7, [#allocation4]  }
 0x1a4   :  { %338 = dma.done.wait [#allocation4], 16  }
 0x1a5   :  { %339 = vsyncadd [#allocation4], 4294967280 }
 0x1a6   :  { %286 = vsyncpa [#allocation4], 1 }

</bundles_post_ra>
